<compile_context>
chip_gen: v5e
topology: v5e:2x2
jax: 0.10.0
libtpu: 0.0.40
codegen_flags: <defaults>
</compile_context>

<pallas_src>
import functools

import jax
import jax.numpy as jnp
from jax import lax
from jax.experimental import pallas as pl
from jax.experimental.pallas import tpu as pltpu

_LANE = 128
_MAX_BLOCK_N = 16384  # hard ceiling; the real cap is DMA/VMEM adaptive


# ----------------------------------------------------------------------------
# Host-side helpers
# ----------------------------------------------------------------------------
def _cdiv(a, b):
    return -(-a // b)


def _round_up(x, m):
    return _cdiv(x, m) * m


def _num_tensorcores():
    """Best-effort TensorCores-per-chip (v7x: 2, v5e/v6e: 1)."""
    try:
        info = pltpu.get_tpu_info()
        for attr in ("num_cores", "core_count", "num_tensorcores"):
            v = getattr(info, attr, None)
            if v:
                return max(1, min(2, int(v)))
    except Exception:
        pass
    try:
        kind = jax.devices()[0].device_kind.lower()
        if "v7" in kind or "7x" in kind:
            return 2
    except Exception:
        pass
    return 1


def _vmem_budget_bytes(num_tc):
    """Per-TensorCore VMEM capacity (conservative)."""
    cap = 0
    try:
        cap = int(getattr(pltpu.get_tpu_info(), "vmem_capacity_bytes", 0) or 0)
    except Exception:
        cap = 0
    if cap <= 0:
        cap = 64 * 1024 * 1024  # conservative default (v7x per-TC VMEM)
    if num_tc > 1:
        # get_tpu_info may report per-chip capacity; per-TC on v7x is 64 MiB.
        cap = min(cap, 64 * 1024 * 1024)
    return cap


def _choose_tiling(n, c, itemsize, *, num_row_streams, f32_temps_per_row,
                   max_groups, max_block_n=None):
    """Row-tile selection: >= ~4 MiB streamed per step, bounded by VMEM.

    Returns (block_n, num_groups, steps_per_group, n_tiles, vmem_limit_bytes).
    """
    vmem_cap = _vmem_budget_bytes(max_groups)
    vmem_limit = int(min(vmem_cap * 0.9, 128 * 1024 * 1024))

    c_lanes = _round_up(c, _LANE)            # lane padding inside VMEM
    row_align = 16 if itemsize < 4 else 8    # sublane packing for bf16

    # Per-row VMEM: double-buffered streamed inputs + f32 intermediates the
    # compiler materializes (z, exp(z), t*z, ...) + lane-padded (block_n, 1)
    # columns (nll accumulator + double-buffered int32 target stream).
    bytes_per_row = (num_row_streams * 2 * c_lanes * itemsize
                     + f32_temps_per_row * c_lanes * 4
                     + 3 * _LANE * 4)
    budget = int(vmem_cap * 0.75)

    # Adaptive cap: per-stream DMA of >= ~4 MiB per grid step so the ~0.35us
    # per-step overhead is negligible.
    dma_rows = _cdiv(4 * 1024 * 1024, max(1, c_lanes * itemsize))
    cap = min(_MAX_BLOCK_N, max(1024, _round_up(dma_rows, row_align)))

    block_n = min(cap, budget // bytes_per_row, _round_up(n, row_align))
    if max_block_n is not None:
        block_n = min(block_n, max_block_n)
    block_n = max(row_align, (block_n // row_align) * row_align)

    n_tiles = _cdiv(n, block_n)
    num_groups = max_groups if n_tiles >= 2 else 1
    num_groups = max(1, min(num_groups, n_tiles))
    steps = _cdiv(n_tiles, num_groups)
    return block_n, num_groups, steps, n_tiles, vmem_limit


# ----------------------------------------------------------------------------
# Kernels
# ----------------------------------------------------------------------------
def _ce_hard_kernel(tgt_ref, x_ref, o_ref, acc_ref, *, total_n, block_n,
                    steps_per_group):
    """Cross-entropy with integer class targets.

    tgt_ref: (block_n, 1) int32  -- per-step streamed target column
    x_ref:   (block_n, C)        -- logits tile (C = full class dim)
    o_ref:   (8, 128) float32    -- per-group partial sum (lane-dense)
    acc_ref: (block_n, 1) float32 per-row NLL accumulator
    """
    g = pl.program_id(0)
    s = pl.program_id(1)

    @pl.when(s == 0)
    def _():
        acc_ref[...] = jnp.zeros_like(acc_ref)

    x = x_ref[...]                                     # native dtype
    t = tgt_ref[...]                                   # (block_n, 1) int32

    # Row max in the native dtype (exact); widen only for the subtraction so
    # bf16 inputs don't need a full-tile f32 copy up front.
    m = jnp.max(x, axis=-1, keepdims=True)
    z = x.astype(jnp.float32) - m.astype(jnp.float32)  # (block_n, C) f32, <= 0
    lse = jnp.log(jnp.sum(jnp.exp(z), axis=-1, keepdims=True))

    # nll = lse - z[target]; (1, C) class-id row is cheap to regenerate.
    classes = lax.broadcasted_iota(jnp.int32, (1, z.shape[-1]), 1)
    picked = jnp.sum(jnp.where(classes == t, z, 0.0), axis=-1, keepdims=True)

    # Mask rows past the end of the batch (ragged last tile / dead tail tiles).
    row0 = (g * steps_per_group + s) * block_n
    row_ids = row0 + lax.broadcasted_iota(jnp.int32, (block_n, 1), 0)
    valid = row_ids < total_n
    acc_ref[...] += jnp.where(valid, lse - picked, 0.0)

    @pl.when(s == pl.num_programs(1) - 1)
    def _():
        o_ref[...] = jnp.zeros_like(o_ref) + jnp.sum(acc_ref[...])


def _ce_soft_kernel(t_ref, x_ref, o_ref, acc_ref, *, total_n, block_n,
                    steps_per_group):
    """Cross-entropy with probability (soft) targets: pred.shape == target.shape."""
    g = pl.program_id(0)
    s = pl.program_id(1)

    @pl.when(s == 0)
    def _():
        acc_ref[...] = jnp.zeros_like(acc_ref)

    x = x_ref[...]
    t = t_ref[...].astype(jnp.float32)

    m = jnp.max(x, axis=-1, keepdims=True)
    z = x.astype(jnp.float32) - m.astype(jnp.float32)
    lse = jnp.log(jnp.sum(jnp.exp(z), axis=-1, keepdims=True))

    sum_t = jnp.sum(t, axis=-1, keepdims=True)
    t_dot_z = jnp.sum(t * z, axis=-1, keepdims=True)

    # Explicit row-validity mask (no zero-padded host targets anymore).
    row0 = (g * steps_per_group + s) * block_n
    row_ids = row0 + lax.broadcasted_iota(jnp.int32, (block_n, 1), 0)
    valid = row_ids < total_n
    # -sum(t * logp) == lse * sum(t) - sum(t * z)   (no sum(t)==1 assumption)
    acc_ref[...] += jnp.where(valid, lse * sum_t - t_dot_z, 0.0)

    @pl.when(s == pl.num_programs(1) - 1)
    def _():
        o_ref[...] = jnp.zeros_like(o_ref) + jnp.sum(acc_ref[...])


# ----------------------------------------------------------------------------
# Wrappers (pallas_call glue)
# ----------------------------------------------------------------------------
def cross_entropy_hard(logits, targets, *, max_block_n=None,
                       force_num_groups=None):
    """logits: (N, C) float, targets: (N,) int -> scalar mean CE loss."""
    N, C = logits.shape
    itemsize = jnp.dtype(logits.dtype).itemsize
    max_groups = force_num_groups or (2 if _num_tensorcores() >= 2 else 1)
    block_n, num_groups, steps, n_tiles, vmem_limit = _choose_tiling(
        N, C, itemsize, num_row_streams=1, f32_temps_per_row=3,
        max_groups=max_groups, max_block_n=max_block_n)

    tgt2d = targets.astype(jnp.int32).reshape(N, 1)
    last_tile = n_tiles - 1

    def tile_map(g, s):
        # Clamp dead trailing tiles of a group onto the last real tile (the
        # kernel masks them out by row index), avoiding fully-OOB blocks.
        return (jnp.minimum(g * steps + s, last_tile), 0)

    kernel = functools.partial(_ce_hard_kernel, total_n=N, block_n=block_n,
                               steps_per_group=steps)
    out = pl.pallas_call(
        kernel,
        out_shape=jax.ShapeDtypeStruct((num_groups * 8, _LANE), jnp.float32),
        grid_spec=pltpu.PrefetchScalarGridSpec(
            num_scalar_prefetch=0,
            grid=(num_groups, steps),
            in_specs=[
                pl.BlockSpec((block_n, 1), tile_map),   # per-step target stream
                pl.BlockSpec((block_n, C), tile_map),   # logits (last dim = C)
            ],
            out_specs=pl.BlockSpec((8, _LANE), lambda g, s: (g, 0)),
            scratch_shapes=[pltpu.VMEM((block_n, 1), jnp.float32)],
        ),
        compiler_params=pltpu.CompilerParams(
            dimension_semantics=("parallel", "arbitrary"),
            vmem_limit_bytes=vmem_limit),
    )(tgt2d, logits)
    return jnp.sum(out[0::8, 0]) / jnp.float32(N)


def cross_entropy_soft(logits, soft_targets, *, max_block_n=None,
                       force_num_groups=None):
    """logits: (N, C), soft_targets: (N, C) probabilities -> scalar mean CE loss."""
    N, C = logits.shape
    itemsize = max(jnp.dtype(logits.dtype).itemsize,
                   jnp.dtype(soft_targets.dtype).itemsize)
    max_groups = force_num_groups or (2 if _num_tensorcores() >= 2 else 1)
    block_n, num_groups, steps, n_tiles, vmem_limit = _choose_tiling(
        N, C, itemsize, num_row_streams=2, f32_temps_per_row=4,
        max_groups=max_groups, max_block_n=max_block_n)

    last_tile = n_tiles - 1

    def tile_map(g, s):
        return (jnp.minimum(g * steps + s, last_tile), 0)

    kernel = functools.partial(_ce_soft_kernel, total_n=N, block_n=block_n,
                               steps_per_group=steps)
    out = pl.pallas_call(
        kernel,
        out_shape=jax.ShapeDtypeStruct((num_groups * 8, _LANE), jnp.float32),
        grid_spec=pltpu.PrefetchScalarGridSpec(
            num_scalar_prefetch=0,
            grid=(num_groups, steps),
            in_specs=[
                pl.BlockSpec((block_n, C), tile_map),   # soft targets
                pl.BlockSpec((block_n, C), tile_map),   # logits
            ],
            out_specs=pl.BlockSpec((8, _LANE), lambda g, s: (g, 0)),
            scratch_shapes=[pltpu.VMEM((block_n, 1), jnp.float32)],
        ),
        compiler_params=pltpu.CompilerParams(
            dimension_semantics=("parallel", "arbitrary"),
            vmem_limit_bytes=vmem_limit),
    )(soft_targets, logits)
    return jnp.sum(out[0::8, 0]) / jnp.float32(N)


def ce_loss_forward(outputs, batch):
    """JAX/Pallas equivalent of CELoss.forward (device handling is implicit)."""
    pred = outputs["outputs"]
    target = batch["targets"]
    if pred.shape == target.shape:
        loss = cross_entropy_soft(pred, target)
    else:
        loss = cross_entropy_hard(pred, target.reshape(-1))
    # Keep the loss on-device; PyTorch's loss.item() would force a host sync
    # per step and break jit tracing.
    loss_dict = {"CE": loss}
    return loss, loss_dict


# ----------------------------------------------------------------------------
# Reference (pure JAX) for verification
# ----------------------------------------------------------------------------
def _ref_ce_hard(logits, targets):
    logp = jax.nn.log_softmax(logits.astype(jnp.float32), axis=-1)
    return -jnp.mean(jnp.take_along_axis(logp, targets[:, None], axis=-1))


def _ref_ce_soft(logits, soft_targets):
    logp = jax.nn.log_softmax(logits.astype(jnp.float32), axis=-1)
    return -jnp.mean(jnp.sum(soft_targets.astype(jnp.float32) * logp, axis=-1))


# ----------------------------------------------------------------------------
# Main
# ----------------------------------------------------------------------------
if __name__ == "__main__":
    key = jax.random.PRNGKey(0)
    k1, k2, k3, k4, k5, k6, k7, k8 = jax.random.split(key, 8)

    # Case 1: batch=8, classes=32 (lane-sparse C, no padding needed), 1 tile.
    N1, C1 = 8, 32
    logits1 = jax.random.normal(k1, (N1, C1), dtype=jnp.float32)
    hard1 = jax.random.randint(k2, (N1,), 0, C1, dtype=jnp.int32)
    soft1 = jax.nn.softmax(jax.random.normal(k3, (N1, C1), jnp.float32), -1)

    loss_h1, loss_dict = ce_loss_forward({"outputs": logits1},
                                         {"targets": hard1})
    loss_s1, _ = ce_loss_forward({"outputs": logits1}, {"targets": soft1})
    jax.block_until_ready((loss_h1, loss_s1))

    assert jnp.allclose(loss_h1, _ref_ce_hard(logits1, hard1),
                        rtol=1e-5, atol=1e-5), (loss_h1,)
    assert jnp.allclose(loss_s1, _ref_ce_soft(logits1, soft1),
                        rtol=1e-5, atol=1e-5), (loss_s1,)
    assert "CE" in loss_dict

    # Case 2: non-aligned C, multi-tile, forced 2 row-groups (exercises the
    # parallel axis, clamped dead tail tile and in-kernel row masking).
    N2, C2 = 40, 160
    logits2 = jax.random.normal(k4, (N2, C2), dtype=jnp.float32)
    hard2 = jax.random.randint(k5, (N2,), 0, C2, dtype=jnp.int32)
    soft2 = jax.nn.softmax(jax.random.normal(k6, (N2, C2), jnp.float32), -1)

    lh2 = cross_entropy_hard(logits2, hard2, max_block_n=8, force_num_groups=2)
    ls2 = cross_entropy_soft(logits2, soft2, max_block_n=8, force_num_groups=2)
    jax.block_until_ready((lh2, ls2))

    assert jnp.allclose(lh2, _ref_ce_hard(logits2, hard2),
                        rtol=1e-5, atol=1e-5), (lh2,)
    assert jnp.allclose(ls2, _ref_ce_soft(logits2, soft2),
                        rtol=1e-5, atol=1e-5), (ls2,)

    # Case 3: bf16 logits, ragged batch (N not a multiple of the row tile).
    N3, C3 = 24, 96
    logits3 = jax.random.normal(k7, (N3, C3), dtype=jnp.float32).astype(jnp.bfloat16)
    hard3 = jax.random.randint(k8, (N3,), 0, C3, dtype=jnp.int32)
    lh3 = cross_entropy_hard(logits3, hard3)
    jax.block_until_ready(lh3)
    assert jnp.allclose(lh3, _ref_ce_hard(logits3, hard3),
                        rtol=1e-4, atol=1e-4), (lh3,)

    print("KERNEL_OK")
</pallas_src>

<mosaic_0001>
module attributes {stable_mosaic.version = 11 : i64} {
  func.func @_ce_hard_kernel(%arg0: i32, %arg1: i32, %arg2: memref<8x1xi32, #tpu.memory_space<vmem>>, %arg3: memref<8x32xf32, #tpu.memory_space<vmem>>, %arg4: memref<8x128xf32, #tpu.memory_space<vmem>>, %arg5: memref<8x1xf32, #tpu.memory_space<vmem>>) attributes {dimension_semantics = [#tpu.dimension_semantics<parallel>, #tpu.dimension_semantics<arbitrary>], iteration_bounds = array<i64: 1, 1>, scalar_prefetch = 0 : i64, scratch_operands = 1 : i64, tpu.core_type = #tpu.core_type<tc>, window_params = [{transform_indices = @transform_0, window_bounds = array<i64: 8, 1>}, {transform_indices = @transform_1, window_bounds = array<i64: 8, 32>}, {transform_indices = @transform_2, window_bounds = array<i64: 8, 128>}]} {
    %c0_i32 = arith.constant 0 : i32
    %0 = arith.cmpi eq, %arg1, %c0_i32 : i32
    %1 = arith.extui %0 : i1 to i32
    %c0_i32_0 = arith.constant 0 : i32
    %2 = arith.cmpi ne, %1, %c0_i32_0 : i32
    scf.if %2 {
      %cst_15 = arith.constant 0.000000e+00 : f32
      %38 = vector.broadcast %cst_15 : f32 to vector<8x1xf32>
      %c0_16 = arith.constant 0 : index
      %c0_17 = arith.constant 0 : index
      %39 = vector.load %arg5[%c0_16, %c0_17] : memref<8x1xf32, #tpu.memory_space<vmem>>, vector<8x1xf32>
      tpu.vector_store %arg5[%c0_16, %c0_17], %38 {strides = array<i32>} : memref<8x1xf32, #tpu.memory_space<vmem>>, vector<8x1xf32>,
    } else {
    }
    %c0 = arith.constant 0 : index
    %c0_1 = arith.constant 0 : index
    %3 = vector.load %arg3[%c0, %c0_1] : memref<8x32xf32, #tpu.memory_space<vmem>>, vector<8x32xf32>
    %c0_2 = arith.constant 0 : index
    %c0_3 = arith.constant 0 : index
    %4 = vector.load %arg2[%c0_2, %c0_3] : memref<8x1xi32, #tpu.memory_space<vmem>>, vector<8x1xi32>
    %cst = arith.constant dense<0xFF800000> : vector<8xf32>
    %5 = vector.multi_reduction <maximumf>, %3, %cst [1] : vector<8x32xf32> to vector<8xf32>
    %6 = vector.shape_cast %5 : vector<8xf32> to vector<8x1xf32>
    %7 = vector.broadcast %6 : vector<8x1xf32> to vector<8x32xf32>
    %8 = arith.subf %3, %7 : vector<8x32xf32>
    %9 = math.exp %8 : vector<8x32xf32>
    %cst_4 = arith.constant dense<0.000000e+00> : vector<8xf32>
    %10 = vector.multi_reduction <add>, %9, %cst_4 [1] : vector<8x32xf32> to vector<8xf32>
    %11 = vector.shape_cast %10 : vector<8xf32> to vector<8x1xf32>
    %12 = math.log %11 : vector<8x1xf32>
    %13 = tpu.iota {dimensions = array<i32: 1>} : vector<1x32xi32>
    %14 = vector.broadcast %13 : vector<1x32xi32> to vector<8x32xi32>
    %15 = vector.broadcast %4 : vector<8x1xi32> to vector<8x32xi32>
    %16 = arith.cmpi eq, %14, %15 : vector<8x32xi32>
    %cst_5 = arith.constant 0.000000e+00 : f32
    %17 = vector.broadcast %cst_5 : f32 to vector<8x32xf32>
    %18 = arith.select %16, %8, %17 : vector<8x32xi1>, vector<8x32xf32>
    %cst_6 = arith.constant dense<0.000000e+00> : vector<8xf32>
    %19 = vector.multi_reduction <add>, %18, %cst_6 [1] : vector<8x32xf32> to vector<8xf32>
    %20 = vector.shape_cast %19 : vector<8xf32> to vector<8x1xf32>
    %c1_i32 = arith.constant 1 : i32
    %21 = arith.muli %arg0, %c1_i32 : i32
    %22 = arith.addi %21, %arg1 : i32
    %c8_i32 = arith.constant 8 : i32
    %23 = arith.muli %22, %c8_i32 : i32
    %24 = tpu.iota {dimensions = array<i32: 0>} : vector<8x1xi32>
    %25 = vector.broadcast %23 : i32 to vector<8x1xi32>
    %26 = arith.addi %25, %24 : vector<8x1xi32>
    %c8_i32_7 = arith.constant 8 : i32
    %27 = vector.broadcast %c8_i32_7 : i32 to vector<8x1xi32>
    %28 = arith.cmpi slt, %26, %27 : vector<8x1xi32>
    %c0_8 = arith.constant 0 : index
    %c0_9 = arith.constant 0 : index
    %29 = vector.load %arg5[%c0_8, %c0_9] : memref<8x1xf32, #tpu.memory_space<vmem>>, vector<8x1xf32>
    %30 = arith.subf %12, %20 : vector<8x1xf32>
    %cst_10 = arith.constant 0.000000e+00 : f32
    %31 = vector.broadcast %cst_10 : f32 to vector<8x1xf32>
    %32 = arith.select %28, %30, %31 : vector<8x1xi1>, vector<8x1xf32>
    %33 = arith.addf %29, %32 : vector<8x1xf32>
    %c0_11 = arith.constant 0 : index
    %c0_12 = arith.constant 0 : index
    %34 = vector.load %arg5[%c0_11, %c0_12] : memref<8x1xf32, #tpu.memory_space<vmem>>, vector<8x1xf32>
    tpu.vector_store %arg5[%c0_11, %c0_12], %33 {strides = array<i32>} : memref<8x1xf32, #tpu.memory_space<vmem>>, vector<8x1xf32>,
    %c0_i32_13 = arith.constant 0 : i32
    %35 = arith.cmpi eq, %arg1, %c0_i32_13 : i32
    %36 = arith.extui %35 : i1 to i32
    %c0_i32_14 = arith.constant 0 : i32
    %37 = arith.cmpi ne, %36, %c0_i32_14 : i32
    scf.if %37 {
      %cst_15 = arith.constant 0.000000e+00 : f32
      %38 = vector.broadcast %cst_15 : f32 to vector<8x128xf32>
      %c0_16 = arith.constant 0 : index
      %c0_17 = arith.constant 0 : index
      %39 = vector.load %arg5[%c0_16, %c0_17] : memref<8x1xf32, #tpu.memory_space<vmem>>, vector<8x1xf32>
      %40 = vector.shape_cast %39 : vector<8x1xf32> to vector<1x8x1xf32>
      %cst_18 = arith.constant dense<0.000000e+00> : vector<1xf32>
      %41 = vector.multi_reduction <add>, %40, %cst_18 [1, 2] : vector<1x8x1xf32> to vector<1xf32>
      %42 = vector.shape_cast %41 : vector<1xf32> to vector<1x1x1xf32>
      %43 = vector.extract %42[0, 0, 0] : f32 from vector<1x1x1xf32>
      %44 = vector.broadcast %43 : f32 to vector<8x128xf32>
      %45 = arith.addf %38, %44 : vector<8x128xf32>
      %c0_19 = arith.constant 0 : index
      %c0_20 = arith.constant 0 : index
      %46 = vector.load %arg4[%c0_19, %c0_20] : memref<8x128xf32, #tpu.memory_space<vmem>>, vector<8x128xf32>
      tpu.vector_store %arg4[%c0_19, %c0_20], %45 {strides = array<i32>} : memref<8x128xf32, #tpu.memory_space<vmem>>, vector<8x128xf32>,
    } else {
    }
    return
  }
  func.func @transform_0(%arg0: i32, %arg1: i32) -> (i32, i32) {
    %c1_i32 = arith.constant 1 : i32
    %0 = arith.muli %arg0, %c1_i32 : i32
    %1 = arith.addi %0, %arg1 : i32
    %c0_i32 = arith.constant 0 : i32
    %2 = arith.minsi %1, %c0_i32 : i32
    %c0_i32_0 = arith.constant 0 : i32
    %c0_i32_1 = arith.constant 0 : i32
    return %2, %c0_i32_0 : i32, i32
  }
  func.func @transform_1(%arg0: i32, %arg1: i32) -> (i32, i32) {
    %c1_i32 = arith.constant 1 : i32
    %0 = arith.muli %arg0, %c1_i32 : i32
    %1 = arith.addi %0, %arg1 : i32
    %c0_i32 = arith.constant 0 : i32
    %2 = arith.minsi %1, %c0_i32 : i32
    %c0_i32_0 = arith.constant 0 : i32
    %c0_i32_1 = arith.constant 0 : i32
    return %2, %c0_i32_0 : i32, i32
  }
  func.func @transform_2(%arg0: i32, %arg1: i32) -> (i32, i32) {
    %c0_i32 = arith.constant 0 : i32
    %c0_i32_0 = arith.constant 0 : i32
    return %arg0, %c0_i32 : i32, i32
  }
}

</mosaic_0001>

<bundles_post_ra>
// kernel: tpu_custom_call.1
= control target key start
LH: loop header
LB: loop body
LE: loop exit
PB: predicated region body
PF: predicated region fallthrough
CT: control target
= control target key end

     0   :  { %vm74_vm0 = vcmask 261120   ;;  %s220_s0 = inlined_call_operand.vmem [shape: s32[8,1], index: 0, kind: input, shape index: {}]   ;;  %s221_s1 = inlined_call_operand.vmem [shape: f32[8,32], index: 1, kind: input, shape index: {}]   ;;  %s222_s2 = inlined_call_operand.hbm [shape: f32[8,128], index: 2, kind: output, shape index: {}]  }
   0x1   :  { %v72_v0 = vld [vmem:[%s221_s1] sm:$0xff] }
   0x2   :  { %7 = vsyncpa [#allocation4], 0  ;;  %v75_v1 = vsel %vm74_vm0, %v72_v0, -inf  ;;  %v190_v2 = vmov 0   ;;  %v73_v3 = vld [vmem:[%s220_s0] sm:$0xff]  ;;  %v86_v9 = vlaneseq  ;;  %vm70_vm2 = vcmask 7168  }
   0x3   :  { %159 = vset.pattern.permute.xlu0 %v190_v2  ;;  %v191_v14 = vmov 0.0   ;;  %s192_s0 = smov [#allocation3]   ;;  %s133_s15 = sshll.u32 %s222_s2, 4  ;;  %s134_s15 = int_to_ptr.hbm [resolvable:$true] %s133_s15 }
   0x4   :  { %76 = vmax.xlane.f32.xlu0 %v75_v1  ;;  %v87_v10 = vand.u32 127, %v86_v9  ;;  %71 = vst.msk [vmem:[#allocation2] sm:$0xff] %vm70_vm2, %v191_v14  ;;  %s131_s1 = sshll.u32 %s192_s0, 4  ;;  %s132_s1 = int_to_ptr.vmem [resolvable:$true] %s131_s1 }
   0xb   :  { %v103_v19 = vld [vmem:[#allocation2] sm:$0xff] }
  0x18   :  { %89 = vperm.xlu0 %159, %v73_v3  }
  0x77   :  { %v77_v4 = vpop.xlane.xlu0 %76 }
  0x78   :  { %v78_v5 = vsub.f32 %v72_v0, %v77_v4 }
  0x7a   :  { %v79_v6 = vmul.f32 1.442695, %v78_v5 }
  0x7c   :  { %160 = vpow2.f32 %v79_v6 }
  0x82   :  { %v161_v7 = vpop.eup %160 }
  0x83   :  { %v81_v8 = vsel %vm74_vm0, %v161_v7, 0.0 }
  0x84   :  { %82 = vadd.xlane.f32.xlu1 %v81_v8 }
  0x8a   :  { %v90_v11 = vpop.permute.xlu0 %89 }
  0x8b   :  { %vm91_vm1 = vcmp.eq.s32.totalorder %v87_v10, %v90_v11 }
  0x8c   :  { %v92_v12 = vsel %vm91_vm1, %v78_v5, 0.0 }
  0x8d   :  { %v93_v13 = vsel %vm74_vm0, %v92_v12, 0.0 }
  0x8e   :  { %94 = vadd.xlane.f32.xlu1 %v93_v13 }
  0xf7   :  { %v83_v15 = vpop.xlane.xlu1 %82 }
  0xf8   :  { %162 = vlog2.f32 %v83_v15 }
  0xfe   :  { %v163_v16 = vpop.eup %162 }
  0xff   :  { %v85_v17 = vmul.f32 0.6931472, %v163_v16 }
 0x101   :  { %v95_v18 = vpop.xlane.xlu1 %94 }
 0x102   :  { %v104_v20 = vsub.f32 %v85_v17, %v95_v18 }
 0x104   :  { %v106_v21 = vadd.f32 %v104_v20, %v103_v19 }
 0x106   :  { %108 = vst.msk [vmem:[#allocation2] sm:$0xff] %vm70_vm2, %v106_v21 }
 0x10d   :  { %v112_v22 = vld [vmem:[#allocation2] sm:$0xff] }
 0x10e   :  { %v113_v23 = vsel %vm70_vm2, %v112_v22, 0.0 }
 0x10f   :  { %114 = vadd.xlane.f32.xlu2 %v113_v23 }
 0x182   :  { %v115_v24 = vpop.xlane.xlu2 %114 }
 0x183   :  { %v116_v25 = vrot.slane %v115_v24, 4 }
 0x185   :  { %v117_v26 = vadd.f32 %v116_v25, %v115_v24 }
 0x187   :  { %v118_v27 = vrot.slane %v117_v26, 2 }
 0x189   :  { %v119_v28 = vadd.f32 %v118_v27, %v117_v26 }
 0x18b   :  { %v120_v29 = vrot.slane %v119_v28, 1 }
 0x18d   :  { %v121_v30 = vadd.f32 %v120_v29, %v119_v28 }
 0x18f   :  { %154 = vpush %v121_v30 }
 0x1c0   :  { %s155_s16 = spop %154 }
 0x1c1   :  { %v123_v31 = vstv %s155_s16 }
 0x1c2   :  { %125 = vst [vmem:[#allocation3] sm:$0xff] %v123_v31 }
 0x1c3   :  { %136 = dma.vmem_to_hbm [thread:$0]  %s132_s1, 128, %s134_s15, [#allocation4]  }
 0x1c4   :  { %188 = dma.done.wait [#allocation4], 128  }
 0x1c5   :  { %189 = vsyncadd [#allocation4], 4294967168 }
 0x1c6   :  { %141 = vsyncpa [#allocation4], 1 }

</bundles_post_ra>
